<compile_context>
chip_gen: v7x
topology: tpu7x:2x2x1
jax: 0.10.0
libtpu: 0.0.40
codegen_flags: <defaults>
</compile_context>

<pallas_src>
import numpy as np
import jax
import jax.numpy as jnp
from jax.experimental import pallas as pl
from jax.experimental.pallas import tpu as pltpu


# ------------------- host-side operator construction (cached) -------------------

def _dct_matrix_np(n: int) -> np.ndarray:
    """Orthonormal DCT-II matrix (n, n) in float64: T @ T.T == I."""
    k = np.arange(n, dtype=np.float64)[:, None]
    m = np.arange(n, dtype=np.float64)[None, :]
    mat = np.sqrt(2.0 / n) * np.cos(np.pi * (m + 0.5) * k / n)
    mat[0, :] *= 1.0 / np.sqrt(2.0)
    return mat


def dct_matrix(n: int) -> jnp.ndarray:
    return jnp.asarray(_dct_matrix_np(n), dtype=jnp.float32)


def _build_fused_operators(H, W, m0, m1, bw0, bw1, triL, dtype):
    """Kronecker operators of the fused pipeline.

    kf (H*W, bw0*bw1*m0*m1): forward DCT restricted to the consumed spectral
        corner with the nn.Unfold window shifts and triL zero-padding folded
        in.  Column index = (di*bw1 + dj)*m0*m1 + (r0*m1 + r1).
    ki (m0*m1, H*W): inverse DCT taken directly from the (m0, m1) corner (the
        zero-padded full spectrum is never materialized).
    """
    TH = _dct_matrix_np(H)
    TW = _dct_matrix_np(W)
    p0 = m0 + bw0 - 1 - 2 * triL
    p1 = m1 + bw1 - 1 - 2 * triL
    assert 0 < p0 <= H and 0 < p1 <= W, "modes/bandwidth too large for spatial size"
    MM = m0 * m1
    kf = np.zeros((H * W, bw0 * bw1 * MM), np.float64)
    for di in range(bw0):
        ths = np.zeros((m0, H), np.float64)
        for r0 in range(m0):
            a0 = r0 + di - triL
            if 0 <= a0 < p0:
                ths[r0] = TH[a0]
        for dj in range(bw1):
            tws = np.zeros((m1, W), np.float64)
            for r1 in range(m1):
                a1 = r1 + dj - triL
                if 0 <= a1 < p1:
                    tws[r1] = TW[a1]
            k = di * bw1 + dj
            blk = np.einsum('rh,sw->hwrs', ths, tws).reshape(H * W, MM)
            kf[:, k * MM:(k + 1) * MM] = blk
    ki = np.einsum('rh,sw->rshw', TH[:m0], TW[:m1]).reshape(MM, H * W)
    return jnp.asarray(kf, dtype), jnp.asarray(ki, dtype)


# ------------------------------ fused Pallas kernel ------------------------------

def _pseudo_spectra_kernel(u_ref, kf_ref, w_ref, ki_ref, o_ref):
    """Fused: forward DCT corner + unfold -> quasi-diag multiply -> inverse DCT.

    u_ref : (tb, Cin, H*W)        activations (f32, lane-dense)
    kf_ref: (H*W, KW*MM)          forward/unfold Kronecker operator (mxu dtype)
    w_ref : (Cin, Cout, KW*MM)    weights, lane-dense layout (f32)
    ki_ref: (MM, H*W)             inverse Kronecker operator (mxu dtype)
    o_ref : (tb, Cout, H*W)
    """
    tb, cin, hw = u_ref.shape
    _, cout, kwmm = w_ref.shape
    mm = ki_ref.shape[0]
    kw = kwmm // mm
    cdt = kf_ref.dtype

    # (1) forward transform + unfold shifts as ONE lane-dense MXU matmul,
    #     batch*channel rows folded into the M dimension.
    x = u_ref[...].reshape(tb * cin, hw).astype(cdt)
    patches = jnp.dot(x, kf_ref[...],
                      preferred_element_type=jnp.float32)          # (tb*cin, kw*mm)

    # (2) quasi-diagonal contraction on the VPU (f32): 576-lane MACs over Cin,
    #     then a bw0*bw1-segment lane reduction.  No (B,I,O,X) broadcast in
    #     HBM, no window slicing (folded into kf), no padded spectrum.
    w = w_ref[...]
    om_rows = []
    for t in range(tb):  # unrolled; tb is kept small. TODO(synk): fori_loop for big tiles.
        pt = patches[t * cin:(t + 1) * cin]                        # (cin, kw*mm)
        full = jnp.sum(pt[:, None, :] * w, axis=0)                 # (cout, kw*mm)
        om_t = full[:, 0:mm]
        for k in range(1, kw):
            om_t = om_t + full[:, k * mm:(k + 1) * mm]             # (cout, mm)
        om_rows.append(om_t)
    om = jnp.concatenate(om_rows, axis=0)                          # (tb*cout, mm)

    # (3) inverse transform directly from the (m0, m1) corner: ONE MXU matmul.
    out = jnp.dot(om.astype(cdt), ki_ref[...],
                  preferred_element_type=jnp.float32)              # (tb*cout, hw)
    o_ref[...] = out.reshape(tb, cout, hw).astype(o_ref.dtype)


def _pick_batch_tile(B, Cin):
    """Batch elements per grid step: fill the MXU M dimension (tb*Cin rows)
    while keeping the unrolled per-sample loop short; tb must divide B."""
    best = 1
    for d in range(1, B + 1):
        if B % d == 0 and d * Cin <= 256 and d <= 16:
            best = d
    return best


def pseudo_spectra_forward(u, kf, w_flat, ki):
    """u: (B, Cin, H, W) -> (B, Cout, H, W) via the fused Pallas kernel."""
    B, Cin, H, W = u.shape
    HW = H * W
    _, Cout, KWMM = w_flat.shape
    MM = ki.shape[0]
    assert kf.shape == (HW, KWMM) and ki.shape == (MM, HW)

    tb = _pick_batch_tile(B, Cin)
    grid = (B // tb,)
    u3 = u.reshape(B, Cin, HW)                     # free layout plumbing

    esize = kf.dtype.itemsize
    block_bytes = (4 * tb * Cin * HW + esize * HW * KWMM + 4 * Cin * Cout * KWMM
                   + esize * MM * HW + 4 * tb * Cout * HW)
    # VMEM budget from actual block bytes (double-buffered) + headroom; keep
    # well under v7x's 64 MiB physical VMEM.
    vmem_limit = int(min(48 * 2 ** 20, max(8 * 2 ** 20, 4 * block_bytes)))

    flops = (2 * B * Cin * HW * KWMM            # forward Kronecker matmul
             + 2 * B * Cin * Cout * KWMM        # quasi-diag VPU MACs
             + 2 * B * Cout * MM * HW)          # inverse Kronecker matmul
    bytes_accessed = (4 * B * Cin * HW + esize * HW * KWMM + 4 * Cin * Cout * KWMM
                      + esize * MM * HW + 4 * B * Cout * HW)

    out3 = pl.pallas_call(
        _pseudo_spectra_kernel,
        out_shape=jax.ShapeDtypeStruct((B, Cout, HW), u.dtype),
        grid=grid,
        in_specs=[
            pl.BlockSpec((tb, Cin, HW), lambda i: (i, 0, 0)),
            pl.BlockSpec((HW, KWMM), lambda i: (0, 0)),          # DMA'd once
            pl.BlockSpec((Cin, Cout, KWMM), lambda i: (0, 0, 0)),  # DMA'd once
            pl.BlockSpec((MM, HW), lambda i: (0, 0)),            # DMA'd once
        ],
        out_specs=pl.BlockSpec((tb, Cout, HW), lambda i: (i, 0, 0)),
        compiler_params=pltpu.CompilerParams(
            dimension_semantics=("parallel",),
            vmem_limit_bytes=vmem_limit),
        cost_estimate=pl.CostEstimate(flops=flops, transcendentals=0,
                                      bytes_accessed=bytes_accessed),
    )(u3, kf, w_flat, ki)
    return out3.reshape(B, Cout, H, W)


# ------------------------------------ module ------------------------------------

class PseudoSpectraPallas:
    """Pallas/JAX port of PseudoSpectra with T = orthonormal 2-D DCT-II."""

    def __init__(self, dim, in_channels, out_channels, modes, bandwidth, triL,
                 key, mxu_dtype=jnp.float32):
        assert dim == 2, "This port implements the 2-D (nn.Unfold-based) case."
        self.in_channels = int(in_channels)
        self.out_channels = int(out_channels)
        self.modes = np.asarray(modes, dtype=np.int64)
        self.bandwidth = np.asarray(bandwidth, dtype=np.int64)
        self.triL = int(triL)
        self.mxu_dtype = mxu_dtype
        KW = int(self.bandwidth.prod())
        MM = int(self.modes.prod())
        scale = 1.0 / (in_channels * out_channels)
        # Same layout as the PyTorch parameter: (Cin*bw0*bw1, Cout, m0*m1).
        self.weights = scale * jax.random.uniform(
            key, (in_channels * KW, out_channels, MM), dtype=jnp.float32)
        # Lane-dense weight layout for the kernel, hoisted out of __call__:
        #   w_flat[c, o, k*MM + r] = weights[c*KW + k, o, r]
        self.w_flat = (self.weights.reshape(in_channels, KW, out_channels, MM)
                       .transpose(0, 2, 1, 3)
                       .reshape(in_channels, out_channels, KW * MM))
        self._op_cache = {}

    def _operators(self, H, W):
        if (H, W) not in self._op_cache:
            m0, m1 = int(self.modes[0]), int(self.modes[1])
            bw0, bw1 = int(self.bandwidth[0]), int(self.bandwidth[1])
            kf, ki = _build_fused_operators(H, W, m0, m1, bw0, bw1, self.triL,
                                            self.mxu_dtype)
            # TODO(synk): for large H*W (kf above ~16 MiB) fall back to separable
            # per-axis DCT matmuls instead of the fused Kronecker operator.
            assert kf.size * kf.dtype.itemsize <= 16 * 2 ** 20, \
                "spatial size too large for the fused Kronecker operator"
            self._op_cache[(H, W)] = (kf, ki)
        return self._op_cache[(H, W)]

    def __call__(self, u):
        B, Cin, H, W = u.shape
        assert Cin == self.in_channels
        kf, ki = self._operators(H, W)
        return pseudo_spectra_forward(u, kf, self.w_flat, ki)


# ---------------------- pure-JAX reference for verification ----------------------

def unfold2d(x, kh, kw, pad):
    """torch.nn.Unfold(kernel_size=(kh, kw), padding=pad) for NCHW input."""
    B, C, P0, P1 = x.shape
    xp = jnp.pad(x, ((0, 0), (0, 0), (pad, pad), (pad, pad)))
    h_out = P0 + 2 * pad - kh + 1
    w_out = P1 + 2 * pad - kw + 1
    cols = []
    for i in range(kh):
        for j in range(kw):
            cols.append(xp[:, :, i:i + h_out, j:j + w_out])
    col = jnp.stack(cols, axis=2)                 # (B, C, kh*kw, h_out, w_out)
    return col.reshape(B, C * kh * kw, h_out * w_out)


def ref_forward(u, weights, modes, bandwidth, triL):
    B, Cin, H, W = u.shape
    Cout = weights.shape[1]
    m0, m1 = int(modes[0]), int(modes[1])
    bw0, bw1 = int(bandwidth[0]), int(bandwidth[1])
    TH, TW = dct_matrix(H), dct_matrix(W)
    b = jnp.einsum('km,bcmn,ln->bckl', TH, u, TW, precision='highest')
    p0 = m0 + bw0 - 1 - 2 * triL
    p1 = m1 + bw1 - 1 - 2 * triL
    xpad = unfold2d(b[:, :, :p0, :p1], bw0, bw1, triL)
    om = jnp.einsum('bix,iox->box', xpad, weights,
                    precision='highest').reshape(B, Cout, m0, m1)
    out = jnp.zeros((B, Cout, H, W), u.dtype).at[:, :, :m0, :m1].set(om)
    return jnp.einsum('km,bckl,ln->bcmn', TH, out, TW, precision='highest')


if __name__ == "__main__":
    key = jax.random.PRNGKey(0)
    k_u, k_w = jax.random.split(key)

    B, Cin, Cout, H, W = 2, 4, 4, 16, 16
    modes = np.array([8, 8])
    bandwidth = np.array([3, 3])
    triL = 1

    u = jax.random.normal(k_u, (B, Cin, H, W), dtype=jnp.float32)

    ref = None

    # f32 MXU path: strict check against the f32 reference.
    layer = PseudoSpectraPallas(dim=2, in_channels=Cin, out_channels=Cout,
                                modes=modes, bandwidth=bandwidth, triL=triL,
                                key=k_w, mxu_dtype=jnp.float32)
    out = jax.block_until_ready(layer(u))
    ref = jax.block_until_ready(
        ref_forward(u, layer.weights, modes, bandwidth, triL))
    assert out.shape == (B, Cout, H, W)
    np.testing.assert_allclose(np.asarray(out), np.asarray(ref),
                               rtol=2e-3, atol=2e-3)

    # bf16 MXU path (native MXU dtype on v5e/v6e/v7x): looser tolerance.
    layer_bf16 = PseudoSpectraPallas(dim=2, in_channels=Cin, out_channels=Cout,
                                     modes=modes, bandwidth=bandwidth, triL=triL,
                                     key=k_w, mxu_dtype=jnp.bfloat16)
    out_bf16 = jax.block_until_ready(layer_bf16(u))
    np.testing.assert_allclose(np.asarray(out_bf16), np.asarray(ref),
                               rtol=5e-2, atol=5e-2)

    print("KERNEL_OK")
</pallas_src>

<mosaic_0001>
module attributes {stable_mosaic.version = 11 : i64} {
  func.func @_pseudo_spectra_kernel(%arg0: i32, %arg1: memref<2x4x256xf32, #tpu.memory_space<vmem>>, %arg2: memref<256x576xf32, #tpu.memory_space<vmem>>, %arg3: memref<4x4x576xf32, #tpu.memory_space<vmem>>, %arg4: memref<64x256xf32, #tpu.memory_space<vmem>>, %arg5: memref<2x4x256xf32, #tpu.memory_space<vmem>>) attributes {dimension_semantics = [#tpu.dimension_semantics<parallel>], iteration_bounds = array<i64: 1>, scalar_prefetch = 0 : i64, scratch_operands = 0 : i64, tpu.core_type = #tpu.core_type<tc>, window_params = [{transform_indices = @transform_0, window_bounds = array<i64: 2, 4, 256>}, {pipeline_mode = #tpu.pipeline_mode<synchronous>, transform_indices = @transform_1, window_bounds = array<i64: 256, 576>}, {pipeline_mode = #tpu.pipeline_mode<synchronous>, transform_indices = @transform_2, window_bounds = array<i64: 4, 4, 576>}, {pipeline_mode = #tpu.pipeline_mode<synchronous>, transform_indices = @transform_3, window_bounds = array<i64: 64, 256>}, {transform_indices = @transform_4, window_bounds = array<i64: 2, 4, 256>}]} {
    %c0 = arith.constant 0 : index
    %c0_0 = arith.constant 0 : index
    %c0_1 = arith.constant 0 : index
    %0 = vector.load %arg1[%c0, %c0_0, %c0_1] : memref<2x4x256xf32, #tpu.memory_space<vmem>>, vector<2x4x256xf32>
    %1 = vector.shape_cast %0 : vector<2x4x256xf32> to vector<8x256xf32>
    %c0_2 = arith.constant 0 : index
    %c0_3 = arith.constant 0 : index
    %2 = vector.load %arg2[%c0_2, %c0_3] : memref<256x576xf32, #tpu.memory_space<vmem>>, vector<256x576xf32>
    %cst = arith.constant dense<0.000000e+00> : vector<8x576xf32>
    %3 = tpu.matmul %1, %2, %cst {dimension_numbers = #tpu.dot_dimension_numbers<[1], [0], [0], [1], [0, 0, 1, 1], [], []>} : vector<8x256xf32>, vector<256x576xf32>, vector<8x576xf32> -> vector<8x576xf32>
    %c0_4 = arith.constant 0 : index
    %c0_5 = arith.constant 0 : index
    %c0_6 = arith.constant 0 : index
    %4 = vector.load %arg3[%c0_4, %c0_5, %c0_6] : memref<4x4x576xf32, #tpu.memory_space<vmem>>, vector<4x4x576xf32>
    %5 = vector.extract_strided_slice %3 {offsets = [0, 0], sizes = [4, 576], strides = [1, 1]} : vector<8x576xf32> to vector<4x576xf32>
    %6 = vector.shape_cast %5 : vector<4x576xf32> to vector<4x1x576xf32>
    %7 = vector.broadcast %6 : vector<4x1x576xf32> to vector<4x4x576xf32>
    %8 = arith.mulf %7, %4 : vector<4x4x576xf32>
    %cst_7 = arith.constant dense<0.000000e+00> : vector<4x576xf32>
    %9 = vector.multi_reduction <add>, %8, %cst_7 [0] : vector<4x4x576xf32> to vector<4x576xf32>
    %10 = vector.extract_strided_slice %9 {offsets = [0, 0], sizes = [4, 64], strides = [1, 1]} : vector<4x576xf32> to vector<4x64xf32>
    %11 = vector.extract_strided_slice %9 {offsets = [0, 64], sizes = [4, 64], strides = [1, 1]} : vector<4x576xf32> to vector<4x64xf32>
    %12 = arith.addf %10, %11 : vector<4x64xf32>
    %13 = vector.extract_strided_slice %9 {offsets = [0, 128], sizes = [4, 64], strides = [1, 1]} : vector<4x576xf32> to vector<4x64xf32>
    %14 = arith.addf %12, %13 : vector<4x64xf32>
    %15 = vector.extract_strided_slice %9 {offsets = [0, 192], sizes = [4, 64], strides = [1, 1]} : vector<4x576xf32> to vector<4x64xf32>
    %16 = arith.addf %14, %15 : vector<4x64xf32>
    %17 = vector.extract_strided_slice %9 {offsets = [0, 256], sizes = [4, 64], strides = [1, 1]} : vector<4x576xf32> to vector<4x64xf32>
    %18 = arith.addf %16, %17 : vector<4x64xf32>
    %19 = vector.extract_strided_slice %9 {offsets = [0, 320], sizes = [4, 64], strides = [1, 1]} : vector<4x576xf32> to vector<4x64xf32>
    %20 = arith.addf %18, %19 : vector<4x64xf32>
    %21 = vector.extract_strided_slice %9 {offsets = [0, 384], sizes = [4, 64], strides = [1, 1]} : vector<4x576xf32> to vector<4x64xf32>
    %22 = arith.addf %20, %21 : vector<4x64xf32>
    %23 = vector.extract_strided_slice %9 {offsets = [0, 448], sizes = [4, 64], strides = [1, 1]} : vector<4x576xf32> to vector<4x64xf32>
    %24 = arith.addf %22, %23 : vector<4x64xf32>
    %25 = vector.extract_strided_slice %9 {offsets = [0, 512], sizes = [4, 64], strides = [1, 1]} : vector<4x576xf32> to vector<4x64xf32>
    %26 = arith.addf %24, %25 : vector<4x64xf32>
    %27 = vector.extract_strided_slice %3 {offsets = [4, 0], sizes = [4, 576], strides = [1, 1]} : vector<8x576xf32> to vector<4x576xf32>
    %28 = vector.shape_cast %27 : vector<4x576xf32> to vector<4x1x576xf32>
    %29 = vector.broadcast %28 : vector<4x1x576xf32> to vector<4x4x576xf32>
    %30 = arith.mulf %29, %4 : vector<4x4x576xf32>
    %cst_8 = arith.constant dense<0.000000e+00> : vector<4x576xf32>
    %31 = vector.multi_reduction <add>, %30, %cst_8 [0] : vector<4x4x576xf32> to vector<4x576xf32>
    %32 = vector.extract_strided_slice %31 {offsets = [0, 0], sizes = [4, 64], strides = [1, 1]} : vector<4x576xf32> to vector<4x64xf32>
    %33 = vector.extract_strided_slice %31 {offsets = [0, 64], sizes = [4, 64], strides = [1, 1]} : vector<4x576xf32> to vector<4x64xf32>
    %34 = arith.addf %32, %33 : vector<4x64xf32>
    %35 = vector.extract_strided_slice %31 {offsets = [0, 128], sizes = [4, 64], strides = [1, 1]} : vector<4x576xf32> to vector<4x64xf32>
    %36 = arith.addf %34, %35 : vector<4x64xf32>
    %37 = vector.extract_strided_slice %31 {offsets = [0, 192], sizes = [4, 64], strides = [1, 1]} : vector<4x576xf32> to vector<4x64xf32>
    %38 = arith.addf %36, %37 : vector<4x64xf32>
    %39 = vector.extract_strided_slice %31 {offsets = [0, 256], sizes = [4, 64], strides = [1, 1]} : vector<4x576xf32> to vector<4x64xf32>
    %40 = arith.addf %38, %39 : vector<4x64xf32>
    %41 = vector.extract_strided_slice %31 {offsets = [0, 320], sizes = [4, 64], strides = [1, 1]} : vector<4x576xf32> to vector<4x64xf32>
    %42 = arith.addf %40, %41 : vector<4x64xf32>
    %43 = vector.extract_strided_slice %31 {offsets = [0, 384], sizes = [4, 64], strides = [1, 1]} : vector<4x576xf32> to vector<4x64xf32>
    %44 = arith.addf %42, %43 : vector<4x64xf32>
    %45 = vector.extract_strided_slice %31 {offsets = [0, 448], sizes = [4, 64], strides = [1, 1]} : vector<4x576xf32> to vector<4x64xf32>
    %46 = arith.addf %44, %45 : vector<4x64xf32>
    %47 = vector.extract_strided_slice %31 {offsets = [0, 512], sizes = [4, 64], strides = [1, 1]} : vector<4x576xf32> to vector<4x64xf32>
    %48 = arith.addf %46, %47 : vector<4x64xf32>
    %49 = tpu.concatenate %26, %48 in 0 : vector<4x64xf32>, vector<4x64xf32> -> vector<8x64xf32>
    %c0_9 = arith.constant 0 : index
    %c0_10 = arith.constant 0 : index
    %50 = vector.load %arg4[%c0_9, %c0_10] : memref<64x256xf32, #tpu.memory_space<vmem>>, vector<64x256xf32>
    %cst_11 = arith.constant dense<0.000000e+00> : vector<8x256xf32>
    %51 = tpu.matmul %49, %50, %cst_11 {dimension_numbers = #tpu.dot_dimension_numbers<[1], [0], [0], [1], [0, 0, 1, 1], [], []>} : vector<8x64xf32>, vector<64x256xf32>, vector<8x256xf32> -> vector<8x256xf32>
    %52 = vector.shape_cast %51 : vector<8x256xf32> to vector<2x4x256xf32>
    %c0_12 = arith.constant 0 : index
    %c0_13 = arith.constant 0 : index
    %c0_14 = arith.constant 0 : index
    %53 = vector.load %arg5[%c0_12, %c0_13, %c0_14] : memref<2x4x256xf32, #tpu.memory_space<vmem>>, vector<2x4x256xf32>
    tpu.vector_store %arg5[%c0_12, %c0_13, %c0_14], %52 {strides = array<i32>} : memref<2x4x256xf32, #tpu.memory_space<vmem>>, vector<2x4x256xf32>,
    return
  }
  func.func @transform_0(%arg0: i32) -> (i32, i32, i32) {
    %c0_i32 = arith.constant 0 : i32
    %c0_i32_0 = arith.constant 0 : i32
    %c0_i32_1 = arith.constant 0 : i32
    return %arg0, %c0_i32, %c0_i32_0 : i32, i32, i32
  }
  func.func @transform_1(%arg0: i32) -> (i32, i32) {
    %c0_i32 = arith.constant 0 : i32
    %c0_i32_0 = arith.constant 0 : i32
    %c0_i32_1 = arith.constant 0 : i32
    return %c0_i32, %c0_i32_0 : i32, i32
  }
  func.func @transform_2(%arg0: i32) -> (i32, i32, i32) {
    %c0_i32 = arith.constant 0 : i32
    %c0_i32_0 = arith.constant 0 : i32
    %c0_i32_1 = arith.constant 0 : i32
    %c0_i32_2 = arith.constant 0 : i32
    return %c0_i32, %c0_i32_0, %c0_i32_1 : i32, i32, i32
  }
  func.func @transform_3(%arg0: i32) -> (i32, i32) {
    %c0_i32 = arith.constant 0 : i32
    %c0_i32_0 = arith.constant 0 : i32
    %c0_i32_1 = arith.constant 0 : i32
    return %c0_i32, %c0_i32_0 : i32, i32
  }
  func.func @transform_4(%arg0: i32) -> (i32, i32, i32) {
    %c0_i32 = arith.constant 0 : i32
    %c0_i32_0 = arith.constant 0 : i32
    %c0_i32_1 = arith.constant 0 : i32
    return %arg0, %c0_i32, %c0_i32_0 : i32, i32, i32
  }
}

</mosaic_0001>

<bundles_post_ra>
// kernel: tpu_custom_call.1
= control target key start
LH: loop header
LB: loop body
LE: loop exit
PB: predicated region body
PF: predicated region fallthrough
CT: control target
= control target key end

     0   :  { %s2169_s0 = inlined_call_operand.vmem [shape: f32[2,4,256], index: 0, kind: input, shape index: {}]   ;;  %s2170_s1 = inlined_call_operand.vmem [shape: f32[256,576], index: 1, kind: input, shape index: {}]   ;;  %s2171_s2 = inlined_call_operand.vmem [shape: f32[4,4,576], index: 2, kind: input, shape index: {}]   ;;  %s2172_s3 = inlined_call_operand.vmem [shape: f32[64,256], index: 3, kind: input, shape index: {}]   ;;  %s2173_s4 = inlined_call_operand.hbm [shape: f32[2,4,256], index: 4, kind: output, shape index: {}]  }
   0x1   :  { %v21_v0 = vld [vmem:[%s2170_s1 + $0x8] sm:$0xff]  ;;  %v26_v1 = vld [vmem:[%s2170_s1 + $0x30] sm:$0xff]  ;;  %v23_v2 = vld [vmem:[%s2170_s1 + $0x18] sm:$0xff] }
   0x2   :  { %v1071_v3 = vpack.c.bf16 %v26_v1, %v21_v0  ;;  %v28_v4 = vld [vmem:[%s2170_s1 + $0x40] sm:$0xff]  ;;  %v25_v6 = vld [vmem:[%s2170_s1 + $0x28] sm:$0xff]  ;;  %v22_v9 = vld [vmem:[%s2170_s1 + $0x10] sm:$0xff] }
   0x3   :  { %v20_v5 = vld [vmem:[%s2170_s1] sm:$0xff]  ;;  %v1135_v7 = vpack.c.bf16 %v28_v4, %v23_v2  ;;  %v27_v10 = vld [vmem:[%s2170_s1 + $0x38] sm:$0xff]  ;;  %v33_v14 = vld [vmem:[%s2170_s1 + $0x68] sm:$0xff] }
   0x4   :  { %v1073_v8 = vpack.c.bf16 %v25_v6, %v20_v5  ;;  %v31_v11 = vld [vmem:[%s2170_s1 + $0x58] sm:$0xff]  ;;  %1072 = vmatprep.subr.bf16.mxu0 %v1071_v3  ;;  %v1137_v12 = vpack.c.bf16 %v27_v10, %v22_v9  ;;  %v36_v13 = vld [vmem:[%s2170_s1 + $0x80] sm:$0xff]  ;;  %v38_v15 = vld [vmem:[%s2170_s1 + $0x90] sm:$0xff] }
   0x5   :  { %1136 = vmatprep.subr.bf16.mxu1 %v1135_v7  ;;  %v1075_v16 = vpack.c.bf16 %v36_v13, %v31_v11  ;;  %v1139_v17 = vpack.c.bf16 %v38_v15, %v33_v14  ;;  %v30_v18 = vld [vmem:[%s2170_s1 + $0x50] sm:$0xff]  ;;  %v35_v19 = vld [vmem:[%s2170_s1 + $0x78] sm:$0xff]  ;;  %v32_v20 = vld [vmem:[%s2170_s1 + $0x60] sm:$0xff] }
   0x6   :  { %1074 = vmatpush1.bf16.msra.mxu0 %v1073_v8  ;;  %1138 = vmatpush1.bf16.msra.mxu1 %v1137_v12  ;;  %v1077_v21 = vpack.c.bf16 %v35_v19, %v30_v18  ;;  %v37_v22 = vld [vmem:[%s2170_s1 + $0x88] sm:$0xff]  ;;  %v46_v24 = vld [vmem:[%s2170_s1 + $0xd0] sm:$0xff]  ;;  %v43_v27 = vld [vmem:[%s2170_s1 + $0xb8] sm:$0xff] }
   0x7   :  { %v41_v23 = vld [vmem:[%s2170_s1 + $0xa8] sm:$0xff]  ;;  %1076 = vmatprep.subr.bf16.mxu0 %v1075_v16  ;;  %1140 = vmatprep.subr.bf16.mxu1 %v1139_v17  ;;  %v1141_v25 = vpack.c.bf16 %v37_v22, %v32_v20  ;;  %v48_v28 = vld [vmem:[%s2170_s1 + $0xe0] sm:$0xff]  ;;  %v42_v32 = vld [vmem:[%s2170_s1 + $0xb0] sm:$0xff] }
   0x8   :  { %v1079_v26 = vpack.c.bf16 %v46_v24, %v41_v23  ;;  %v40_v29 = vld [vmem:[%s2170_s1 + $0xa0] sm:$0xff]  ;;  %v1143_v30 = vpack.c.bf16 %v48_v28, %v43_v27  ;;  %v45_v31 = vld [vmem:[%s2170_s1 + $0xc8] sm:$0xff]  ;;  %v47_v33 = vld [vmem:[%s2170_s1 + $0xd8] sm:$0xff] }
   0x9   :  { %v1081_v34 = vpack.c.bf16 %v45_v31, %v40_v29  ;;  %v51_v35 = vld [vmem:[%s2170_s1 + $0xf8] sm:$0xff]  ;;  %v56_v36 = vld [vmem:[%s2170_s1 + $0x120] sm:$0xff]  ;;  %v53_v37 = vld [vmem:[%s2170_s1 + $0x108] sm:$0xff]  ;;  %v1145_v38 = vpack.c.bf16 %v47_v33, %v42_v32 }
   0xa   :  { %1078 = vmatpush1.bf16.msra.mxu0 %v1077_v21  ;;  %1142 = vmatpush1.bf16.msra.mxu1 %v1141_v25  ;;  %v1083_v39 = vpack.c.bf16 %v56_v36, %v51_v35  ;;  %v58_v40 = vld [vmem:[%s2170_s1 + $0x130] sm:$0xff]  ;;  %v55_v42 = vld [vmem:[%s2170_s1 + $0x118] sm:$0xff]  ;;  %v52_v44 = vld [vmem:[%s2170_s1 + $0x100] sm:$0xff] }
   0xb   :  { %1080 = vmatprep.subr.bf16.mxu0 %v1079_v26  ;;  %v50_v41 = vld [vmem:[%s2170_s1 + $0xf0] sm:$0xff]  ;;  %1144 = vmatprep.subr.bf16.mxu1 %v1143_v30  ;;  %v1147_v43 = vpack.c.bf16 %v58_v40, %v53_v37  ;;  %v57_v45 = vld [vmem:[%s2170_s1 + $0x128] sm:$0xff]  ;;  %v63_v48 = vld [vmem:[%s2170_s1 + $0x158] sm:$0xff] }
   0xc   :  { %v61_v46 = vld [vmem:[%s2170_s1 + $0x148] sm:$0xff]  ;;  %v66_v47 = vld [vmem:[%s2170_s1 + $0x170] sm:$0xff]  ;;  %v68_v49 = vld [vmem:[%s2170_s1 + $0x180] sm:$0xff]  ;;  %v1085_v50 = vpack.c.bf16 %v55_v42, %v50_v41  ;;  %v1149_v51 = vpack.c.bf16 %v57_v45, %v52_v44 }
   0xd   :  { %v1087_v52 = vpack.c.bf16 %v66_v47, %v61_v46  ;;  %v60_v53 = vld [vmem:[%s2170_s1 + $0x140] sm:$0xff]  ;;  %v65_v54 = vld [vmem:[%s2170_s1 + $0x168] sm:$0xff]  ;;  %v62_v55 = vld [vmem:[%s2170_s1 + $0x150] sm:$0xff]  ;;  %v1151_v56 = vpack.c.bf16 %v68_v49, %v63_v48 }
   0xe   :  { %1082 = vmatpush1.bf16.msra.mxu0 %v1081_v34  ;;  %1146 = vmatpush1.bf16.msra.mxu1 %v1145_v38  ;;  %v67_v57 = vld [vmem:[%s2170_s1 + $0x178] sm:$0xff]  ;;  %v76_v59 = vld [vmem:[%s2170_s1 + $0x1c0] sm:$0xff]  ;;  %v73_v60 = vld [vmem:[%s2170_s1 + $0x1a8] sm:$0xff]  ;;  %v1089_v62 = vpack.c.bf16 %v65_v54, %v60_v53 }
   0xf   :  { %1084 = vmatprep.subr.bf16.mxu0 %v1083_v39  ;;  %1148 = vmatprep.subr.bf16.mxu1 %v1147_v43  ;;  %v71_v58 = vld [vmem:[%s2170_s1 + $0x198] sm:$0xff]  ;;  %v78_v61 = vld [vmem:[%s2170_s1 + $0x1d0] sm:$0xff]  ;;  %v1153_v63 = vpack.c.bf16 %v67_v57, %v62_v55  ;;  %v72_v3 = vld [vmem:[%s2170_s1 + $0x1a0] sm:$0xff] }
  0x10   :  { %v1091_v0 = vpack.c.bf16 %v76_v59, %v71_v58  ;;  %v70_v1 = vld [vmem:[%s2170_s1 + $0x190] sm:$0xff]  ;;  %v75_v2 = vld [vmem:[%s2170_s1 + $0x1b8] sm:$0xff]  ;;  %v1155_v4 = vpack.c.bf16 %v78_v61, %v73_v60  ;;  %v77_v5 = vld [vmem:[%s2170_s1 + $0x1c8] sm:$0xff] }
  0x11   :  { %v81_v6 = vld [vmem:[%s2170_s1 + $0x1e8] sm:$0xff]  ;;  %v86_v7 = vld [vmem:[%s2170_s1 + $0x210] sm:$0xff]  ;;  %v83_v8 = vld [vmem:[%s2170_s1 + $0x1f8] sm:$0xff]  ;;  %v1093_v10 = vpack.c.bf16 %v75_v2, %v70_v1  ;;  %v1157_v11 = vpack.c.bf16 %v77_v5, %v72_v3 }
  0x12   :  { %1086 = vmatpush1.bf16.msra.mxu0 %v1085_v50  ;;  %1150 = vmatpush1.bf16.msra.mxu1 %v1149_v51  ;;  %v88_v9 = vld [vmem:[%s2170_s1 + $0x220] sm:$0xff]  ;;  %v1095_v12 = vpack.c.bf16 %v86_v7, %v81_v6  ;;  %v85_v14 = vld [vmem:[%s2170_s1 + $0x208] sm:$0xff]  ;;  %v82_v15 = vld [vmem:[%s2170_s1 + $0x1f0] sm:$0xff] }
  0x13   :  { %1088 = vmatprep.subr.bf16.mxu0 %v1087_v52  ;;  %1152 = vmatprep.subr.bf16.mxu1 %v1151_v56  ;;  %v80_v13 = vld [vmem:[%s2170_s1 + $0x1e0] sm:$0xff]  ;;  %v1159_v16 = vpack.c.bf16 %v88_v9, %v83_v8  ;;  %v87_v17 = vld [vmem:[%s2170_s1 + $0x218] sm:$0xff]  ;;  %v93_v20 = vld [vmem:[%s2170_s1 + $0x248] sm:$0xff] }
  0x14   :  { %v91_v18 = vld [vmem:[%s2170_s1 + $0x238] sm:$0xff]  ;;  %v96_v19 = vld [vmem:[%s2170_s1 + $0x260] sm:$0xff]  ;;  %v98_v21 = vld [vmem:[%s2170_s1 + $0x270] sm:$0xff]  ;;  %v1097_v22 = vpack.c.bf16 %v85_v14, %v80_v13  ;;  %v1161_v23 = vpack.c.bf16 %v87_v17, %v82_v15 }
  0x15   :  { %v1099_v24 = vpack.c.bf16 %v96_v19, %v91_v18  ;;  %v90_v25 = vld [vmem:[%s2170_s1 + $0x230] sm:$0xff]  ;;  %v95_v26 = vld [vmem:[%s2170_s1 + $0x258] sm:$0xff]  ;;  %v92_v27 = vld [vmem:[%s2170_s1 + $0x240] sm:$0xff]  ;;  %v1163_v28 = vpack.c.bf16 %v98_v21, %v93_v20 }
  0x16   :  { %1090 = vmatpush1.bf16.msra.mxu0 %v1089_v62  ;;  %1154 = vmatpush1.bf16.msra.mxu1 %v1153_v63  ;;  %v97_v29 = vld [vmem:[%s2170_s1 + $0x268] sm:$0xff]  ;;  %v106_v31 = vld [vmem:[%s2170_s1 + $0x2b0] sm:$0xff]  ;;  %v103_v32 = vld [vmem:[%s2170_s1 + $0x298] sm:$0xff]  ;;  %v1101_v34 = vpack.c.bf16 %v95_v26, %v90_v25 }
  0x17   :  { %1092 = vmatprep.subr.bf16.mxu0 %v1091_v0  ;;  %1156 = vmatprep.subr.bf16.mxu1 %v1155_v4  ;;  %v101_v30 = vld [vmem:[%s2170_s1 + $0x288] sm:$0xff]  ;;  %v108_v33 = vld [vmem:[%s2170_s1 + $0x2c0] sm:$0xff]  ;;  %v1165_v35 = vpack.c.bf16 %v97_v29, %v92_v27  ;;  %v102_v39 = vld [vmem:[%s2170_s1 + $0x290] sm:$0xff] }
  0x18   :  { %v1103_v36 = vpack.c.bf16 %v106_v31, %v101_v30  ;;  %v100_v37 = vld [vmem:[%s2170_s1 + $0x280] sm:$0xff]  ;;  %v105_v38 = vld [vmem:[%s2170_s1 + $0x2a8] sm:$0xff]  ;;  %v1167_v40 = vpack.c.bf16 %v108_v33, %v103_v32  ;;  %v107_v41 = vld [vmem:[%s2170_s1 + $0x2b8] sm:$0xff] }
  0x19   :  { %v111_v42 = vld [vmem:[%s2170_s1 + $0x2d8] sm:$0xff]  ;;  %v116_v43 = vld [vmem:[%s2170_s1 + $0x300] sm:$0xff]  ;;  %v113_v44 = vld [vmem:[%s2170_s1 + $0x2e8] sm:$0xff]  ;;  %v1105_v46 = vpack.c.bf16 %v105_v38, %v100_v37  ;;  %v1169_v47 = vpack.c.bf16 %v107_v41, %v102_v39 }
  0x1a   :  { %1094 = vmatpush1.bf16.msra.mxu0 %v1093_v10  ;;  %1158 = vmatpush1.bf16.msra.mxu1 %v1157_v11  ;;  %v118_v45 = vld [vmem:[%s2170_s1 + $0x310] sm:$0xff]  ;;  %v1107_v48 = vpack.c.bf16 %v116_v43, %v111_v42  ;;  %v115_v50 = vld [vmem:[%s2170_s1 + $0x2f8] sm:$0xff]  ;;  %v112_v51 = vld [vmem:[%s2170_s1 + $0x2e0] sm:$0xff] }
  0x1b   :  { %1096 = vmatprep.subr.bf16.mxu0 %v1095_v12  ;;  %1160 = vmatprep.subr.bf16.mxu1 %v1159_v16  ;;  %v110_v49 = vld [vmem:[%s2170_s1 + $0x2d0] sm:$0xff]  ;;  %v1171_v52 = vpack.c.bf16 %v118_v45, %v113_v44  ;;  %v117_v53 = vld [vmem:[%s2170_s1 + $0x308] sm:$0xff]  ;;  %v123_v56 = vld [vmem:[%s2170_s1 + $0x338] sm:$0xff] }
  0x1c   :  { %v121_v54 = vld [vmem:[%s2170_s1 + $0x328] sm:$0xff]  ;;  %v126_v55 = vld [vmem:[%s2170_s1 + $0x350] sm:$0xff]  ;;  %v128_v57 = vld [vmem:[%s2170_s1 + $0x360] sm:$0xff]  ;;  %v1109_v58 = vpack.c.bf16 %v115_v50, %v110_v49  ;;  %v1173_v59 = vpack.c.bf16 %v117_v53, %v112_v51 }
  0x1d   :  { %v1111_v60 = vpack.c.bf16 %v126_v55, %v121_v54  ;;  %v120_v61 = vld [vmem:[%s2170_s1 + $0x320] sm:$0xff]  ;;  %v125_v62 = vld [vmem:[%s2170_s1 + $0x348] sm:$0xff]  ;;  %v122_v63 = vld [vmem:[%s2170_s1 + $0x330] sm:$0xff]  ;;  %v1175_v0 = vpack.c.bf16 %v128_v57, %v123_v56 }
  0x1e   :  { %1098 = vmatpush1.bf16.msra.mxu0 %v1097_v22  ;;  %1162 = vmatpush1.bf16.msra.mxu1 %v1161_v23  ;;  %v127_v1 = vld [vmem:[%s2170_s1 + $0x358] sm:$0xff]  ;;  %v136_v3 = vld [vmem:[%s2170_s1 + $0x3a0] sm:$0xff]  ;;  %v133_v4 = vld [vmem:[%s2170_s1 + $0x388] sm:$0xff]  ;;  %v1113_v6 = vpack.c.bf16 %v125_v62, %v120_v61 }
  0x1f   :  { %1100 = vmatprep.subr.bf16.mxu0 %v1099_v24  ;;  %1164 = vmatprep.subr.bf16.mxu1 %v1163_v28  ;;  %v131_v2 = vld [vmem:[%s2170_s1 + $0x378] sm:$0xff]  ;;  %v138_v5 = vld [vmem:[%s2170_s1 + $0x3b0] sm:$0xff]  ;;  %v1177_v9 = vpack.c.bf16 %v127_v1, %v122_v63  ;;  %v132_v11 = vld [vmem:[%s2170_s1 + $0x380] sm:$0xff] }
  0x20   :  { %v130_v7 = vld [vmem:[%s2170_s1 + $0x370] sm:$0xff]  ;;  %v135_v8 = vld [vmem:[%s2170_s1 + $0x398] sm:$0xff]  ;;  %v1115_v10 = vpack.c.bf16 %v136_v3, %v131_v2  ;;  %v137_v12 = vld [vmem:[%s2170_s1 + $0x3a8] sm:$0xff]  ;;  %v1179_v14 = vpack.c.bf16 %v138_v5, %v133_v4 }
  0x21   :  { %v141_v13 = vld [vmem:[%s2170_s1 + $0x3c8] sm:$0xff]  ;;  %v146_v15 = vld [vmem:[%s2170_s1 + $0x3f0] sm:$0xff]  ;;  %v143_v16 = vld [vmem:[%s2170_s1 + $0x3d8] sm:$0xff]  ;;  %v1117_v19 = vpack.c.bf16 %v135_v8, %v130_v7  ;;  %v1181_v20 = vpack.c.bf16 %v137_v12, %v132_v11 }
  0x22   :  { %1102 = vmatpush1.bf16.msra.mxu0 %v1101_v34  ;;  %1166 = vmatpush1.bf16.msra.mxu1 %v1165_v35  ;;  %v148_v17 = vld [vmem:[%s2170_s1 + $0x400] sm:$0xff]  ;;  %v1119_v21 = vpack.c.bf16 %v146_v15, %v141_v13  ;;  %v145_v23 = vld [vmem:[%s2170_s1 + $0x3e8] sm:$0xff]  ;;  %v142_v24 = vld [vmem:[%s2170_s1 + $0x3d0] sm:$0xff] }
  0x23   :  { %1104 = vmatprep.subr.bf16.mxu0 %v1103_v36  ;;  %1168 = vmatprep.subr.bf16.mxu1 %v1167_v40  ;;  %v1622_v18 = vld [vmem:[%s2169_s0 + $0x4] ss:$8 sps:$4 sm:$0xff]   ;;  %v1183_v25 = vpack.c.bf16 %v148_v17, %v143_v16  ;;  %v147_v26 = vld [vmem:[%s2170_s1 + $0x3f8] sm:$0xff]  ;;  %v158_v30 = vld [vmem:[%s2170_s1 + $0x450] sm:$0xff] }
  0x24   :  { %v140_v22 = vld [vmem:[%s2170_s1 + $0x3c0] sm:$0xff]  ;;  %v151_v27 = vld [vmem:[%s2170_s1 + $0x418] sm:$0xff]  ;;  %250 = vmatprep.mubr.f32.mxu0 %v1622_v18  ;;  %v153_v29 = vld [vmem:[%s2170_s1 + $0x428] sm:$0xff]  ;;  %321 = vmatprep.mubr.f32.mxu1 %v1622_v18  ;;  %v1185_v32 = vpack.c.bf16 %v147_v26, %v142_v24 }
  0x25   :  { %v156_v28 = vld [vmem:[%s2170_s1 + $0x440] sm:$0xff]  ;;  %v1121_v31 = vpack.c.bf16 %v145_v23, %v140_v22  ;;  %v150_v34 = vld [vmem:[%s2170_s1 + $0x410] sm:$0xff]  ;;  %v155_v35 = vld [vmem:[%s2170_s1 + $0x438] sm:$0xff]  ;;  %v1187_v37 = vpack.c.bf16 %v158_v30, %v153_v29 }
  0x26   :  { %1106 = vmatpush1.bf16.msra.mxu0 %v1105_v46  ;;  %1170 = vmatpush1.bf16.msra.mxu1 %v1169_v47  ;;  %v1123_v33 = vpack.c.bf16 %v156_v28, %v151_v27  ;;  %v152_v36 = vld [vmem:[%s2170_s1 + $0x420] sm:$0xff]  ;;  %v157_v38 = vld [vmem:[%s2170_s1 + $0x448] sm:$0xff]  ;;  %v166_v40 = vld [vmem:[%s2170_s1 + $0x490] sm:$0xff]  ;;  %v1125_v43 = vpack.c.bf16 %v155_v35, %v150_v34 }
  0x27   :  { %1108 = vmatprep.subr.bf16.mxu0 %v1107_v48  ;;  %1172 = vmatprep.subr.bf16.mxu1 %v1171_v52  ;;  %v161_v39 = vld [vmem:[%s2170_s1 + $0x468] sm:$0xff]  ;;  %v163_v41 = vld [vmem:[%s2170_s1 + $0x478] sm:$0xff]  ;;  %v168_v42 = vld [vmem:[%s2170_s1 + $0x4a0] sm:$0xff]  ;;  %v1189_v45 = vpack.c.bf16 %v157_v38, %v152_v36 }
  0x28   :  { %v160_v44 = vld [vmem:[%s2170_s1 + $0x460] sm:$0xff]  ;;  %v1127_v46 = vpack.c.bf16 %v166_v40, %v161_v39  ;;  %v165_v47 = vld [vmem:[%s2170_s1 + $0x488] sm:$0xff]  ;;  %v162_v48 = vld [vmem:[%s2170_s1 + $0x470] sm:$0xff]  ;;  %v1191_v50 = vpack.c.bf16 %v168_v42, %v163_v41 }
  0x29   :  { %v167_v49 = vld [vmem:[%s2170_s1 + $0x498] sm:$0xff]  ;;  %v176_v52 = vld [vmem:[%s2170_s1 + $0x4e0] sm:$0xff] }
  0x2a   :  { %1110 = vmatpush1.bf16.msra.mxu0 %v1109_v58  ;;  %1174 = vmatpush1.bf16.msra.mxu1 %v1173_v59  ;;  %v171_v51 = vld [vmem:[%s2170_s1 + $0x4b8] sm:$0xff] }
  0x2b   :  { %1112 = vmatprep.subr.bf16.mxu0 %v1111_v60  ;;  %1176 = vmatprep.subr.bf16.mxu1 %v1175_v0 }
  0x2e   :  { %1114 = vmatpush1.bf16.msra.mxu0 %v1113_v6  ;;  %1178 = vmatpush1.bf16.msra.mxu1 %v1177_v9 }
  0x2f   :  { %1116 = vmatprep.subr.bf16.mxu0 %v1115_v10  ;;  %1180 = vmatprep.subr.bf16.mxu1 %v1179_v14 }
  0x32   :  { %1118 = vmatpush1.bf16.msra.mxu0 %v1117_v19  ;;  %1182 = vmatpush1.bf16.msra.mxu1 %v1181_v20 }
  0x33   :  { %1120 = vmatprep.subr.bf16.mxu0 %v1119_v21  ;;  %1184 = vmatprep.subr.bf16.mxu1 %v1183_v25 }
  0x36   :  { %1122 = vmatpush1.bf16.msra.mxu0 %v1121_v31  ;;  %1186 = vmatpush1.bf16.msra.mxu1 %v1185_v32 }
  0x37   :  { %1124 = vmatprep.subr.bf16.mxu0 %v1123_v33  ;;  %1188 = vmatprep.subr.bf16.mxu1 %v1187_v37 }
  0x38   :  { %9 = vsyncpa [#allocation3], 0  ;;  %v173_v53 = vld [vmem:[%s2170_s1 + $0x4c8] sm:$0xff]  ;;  %v178_v54 = vld [vmem:[%s2170_s1 + $0x4f0] sm:$0xff]  ;;  %v1129_v55 = vpack.c.bf16 %v165_v47, %v160_v44  ;;  %v1193_v56 = vpack.c.bf16 %v167_v49, %v162_v48  ;;  %v1131_v57 = vpack.c.bf16 %v176_v52, %v171_v51  ;;  %v420_v52 = vlaneseq  ;;  %s1289_s13 = smov 64  }
  0x39   :  { %v170_v58 = vld [vmem:[%s2170_s1 + $0x4b0] sm:$0xff]  ;;  %v175_v59 = vld [vmem:[%s2170_s1 + $0x4d8] sm:$0xff]  ;;  %v172_v60 = vld [vmem:[%s2170_s1 + $0x4c0] sm:$0xff]  ;;  %v1195_v61 = vpack.c.bf16 %v178_v54, %v173_v53  ;;  %vm617_vm0 = vcmask 1043456   ;;  %vm646_vm1 = vcmask 519168   ;;  %vm936_vm2 = vcmask 523264  }
  0x3a   :  { %1126 = vmatpush1.bf16.msra.mxu0 %v1125_v43  ;;  %1190 = vmatpush1.bf16.msra.mxu1 %v1189_v45  ;;  %v177_v62 = vld [vmem:[%s2170_s1 + $0x4e8] sm:$0xff]  ;;  %v104_v63 = vld [vmem:[%s2170_s1 + $0x2a0] sm:$0xff]  ;;  %v1133_v1 = vpack.c.bf16 %v175_v59, %v170_v58  ;;  %v114_v6 = vld [vmem:[%s2170_s1 + $0x2f0] sm:$0xff]  ;;  %v421_v54 = vshrl.u32 %v420_v52, 7 }
  0x3b   :  { %1128 = vmatprep.subr.bf16.mxu0 %v1127_v46  ;;  %1192 = vmatprep.subr.bf16.mxu1 %v1191_v50  ;;  %v109_v0 = vld [vmem:[%s2170_s1 + $0x2c8] sm:$0xff]  ;;  %v1197_v2 = vpack.c.bf16 %v177_v62, %v172_v60  ;;  %v24_v4 = vld [vmem:[%s2170_s1 + $0x20] sm:$0xff]  ;;  %v119_v7 = vld [vmem:[%s2170_s1 + $0x318] sm:$0xff]  ;;  %v1288_v50 = vmov 1966171168  }
  0x3c   :  { %v1199_v3 = vpack.c.bf16 %v109_v0, %v104_v63  ;;  %v29_v5 = vld [vmem:[%s2170_s1 + $0x48] sm:$0xff]  ;;  %v1203_v10 = vpack.c.bf16 %v119_v7, %v114_v6  ;;  %v34_v11 = vld [vmem:[%s2170_s1 + $0x70] sm:$0xff]  ;;  %v39_v12 = vld [vmem:[%s2170_s1 + $0x98] sm:$0xff]  ;;  %v418_v51 = vunpack.c.l.s4 %v1288_v50 }
  0x3d   :  { %v1255_v8 = vld [vmem:[%s2169_s0] ss:$8 sps:$4 sm:$0xff]   ;;  %v1201_v9 = vpack.c.bf16 %v29_v5, %v24_v4  ;;  %v1205_v15 = vpack.c.bf16 %v39_v12, %v34_v11  ;;  %v134_v20 = vld [vmem:[%s2170_s1 + $0x390] sm:$0xff]  ;;  %v139_v21 = vld [vmem:[%s2170_s1 + $0x3b8] sm:$0xff] }
  0x3e   :  { %1130 = vmatpush1.bf16.msra.mxu0 %v1129_v55  ;;  %1194 = vmatpush1.bf16.msra.mxu1 %v1193_v56  ;;  %v124_v13 = vld [vmem:[%s2170_s1 + $0x340] sm:$0xff]  ;;  %v129_v14 = vld [vmem:[%s2170_s1 + $0x368] sm:$0xff]  ;;  %v1211_v23 = vpack.c.bf16 %v139_v21, %v134_v20  ;;  %v54_v24 = vld [vmem:[%s2170_s1 + $0x110] sm:$0xff]  ;;  %v419_v53 = vunpack.c.0.s8 %v418_v51 }
  0x3f   :  { %1132 = vmatprep.subr.bf16.mxu0 %v1131_v57  ;;  %1196 = vmatprep.subr.bf16.mxu1 %v1195_v61  ;;  %v1207_v16 = vpack.c.bf16 %v129_v14, %v124_v13  ;;  %v44_v17 = vld [vmem:[%s2170_s1 + $0xc0] sm:$0xff]  ;;  %v49_v19 = vld [vmem:[%s2170_s1 + $0xe8] sm:$0xff]  ;;  %v154_v31 = vld [vmem:[%s2170_s1 + $0x430] sm:$0xff] }
  0x40   :  { %v1209_v22 = vpack.c.bf16 %v49_v19, %v44_v17  ;;  %v144_v25 = vld [vmem:[%s2170_s1 + $0x3e0] sm:$0xff]  ;;  %v149_v26 = vld [vmem:[%s2170_s1 + $0x408] sm:$0xff]  ;;  %v159_v32 = vld [vmem:[%s2170_s1 + $0x458] sm:$0xff]  ;;  %v422_v56 = vsub.s32 %v419_v53, %v421_v54  ;;  %v1841_v19 = vsub.s32 0, %v421_v54 }
  0x41   :  { %v1215_v28 = vpack.c.bf16 %v149_v26, %v144_v25  ;;  %v64_v29 = vld [vmem:[%s2170_s1 + $0x160] sm:$0xff]  ;;  %v69_v30 = vld [vmem:[%s2170_s1 + $0x188] sm:$0xff]  ;;  %v1219_v34 = vpack.c.bf16 %v159_v32, %v154_v31  ;;  %v74_v35 = vld [vmem:[%s2170_s1 + $0x1b0] sm:$0xff]  ;;  %v1865_v26 = vsub.s32 2, %v421_v54 }
  0x42   :  { %1134 = vmatpush1.bf16.msra.mxu0 %v1133_v1  ;;  %1198 = vmatpush1.bf16.msra.mxu1 %v1197_v2  ;;  %v1217_v33 = vpack.c.bf16 %v69_v30, %v64_v29  ;;  %v79_v36 = vld [vmem:[%s2170_s1 + $0x1d8] sm:$0xff]  ;;  %v164_v37 = vld [vmem:[%s2170_s1 + $0x480] sm:$0xff]  ;;  %v169_v38 = vld [vmem:[%s2170_s1 + $0x4a8] sm:$0xff] }
  0x43   :  { %1200 = vmatprep.subr.bf16.mxu0 %v1199_v3  ;;  %v1221_v39 = vpack.c.bf16 %v79_v36, %v74_v35  ;;  %v1223_v40 = vpack.c.bf16 %v169_v38, %v164_v37  ;;  %v84_v41 = vld [vmem:[%s2170_s1 + $0x200] sm:$0xff]  ;;  %v89_v42 = vld [vmem:[%s2170_s1 + $0x228] sm:$0xff]  ;;  %v174_v43 = vld [vmem:[%s2170_s1 + $0x4d0] sm:$0xff]  ;;  %v1886_v37 = vsub.s32 4, %v421_v54 }
  0x44   :  { %v179_v44 = vld [vmem:[%s2170_s1 + $0x4f8] sm:$0xff]  ;;  %v1225_v45 = vpack.c.bf16 %v89_v42, %v84_v41  ;;  %v94_v47 = vld [vmem:[%s2170_s1 + $0x250] sm:$0xff]  ;;  %v1823_v12 = vld [vmem:[%s2171_s2 + $0x28] sm:$0xff] }
  0x45   :  { %251 = vmatmul.mubr.f32.vlgmr.msra.gmra.mrb[0].mxu0 %v1255_v8  ;;  %322 = vmatmul.mubr.f32.vlgmr.msra.gmra.mrb[0].mxu1 %v1255_v8  ;;  %v1227_v46 = vpack.c.bf16 %v179_v44, %v174_v43  ;;  %v99_v48 = vld [vmem:[%s2170_s1 + $0x278] sm:$0xff] }
  0x46   :  { %1202 = vmatpush3.bf16.msra.mxu0 %v1201_v9  ;;  %392 = vmatprep.mubr.f32.mxu0 %v1622_v18  ;;  %v59_v18 = vld [vmem:[%s2170_s1 + $0x138] sm:$0xff]  ;;  %v1229_v49 = vpack.c.bf16 %v99_v48, %v94_v47  ;;  %v1813_v9 = vld [vmem:[%s2171_s2] sm:$0xff] }
  0x47   :  { %1204 = vmatprep.subr.bf16.mxu0 %v1203_v10  ;;  %v1213_v27 = vpack.c.bf16 %v59_v18, %v54_v24  ;;  %v1818_v11 = vld [vmem:[%s2171_s2 + $0x14] sm:$0xff]  ;;  %v1828_v14 = vld [vmem:[%s2171_s2 + $0x3c] sm:$0xff]  ;;  %v1839_v17 = vcombine.high %v1813_v9, %v1813_v9 }
  0x48   :  { %v1854_v24 = vld [vmem:[%s2171_s2 + $0x1c] sm:$0xff]  ;;  %v1859_v18 = vld [vmem:[%s2171_s2 + $0x30] sm:$0xff]  ;;  %v1863_v25 = vcombine.high %v1828_v14, %v1828_v14 }
  0x49   :  { %v1880_v35 = vcombine.high %v1854_v24, %v1854_v24  ;;  %v1884_v36 = vcombine.high %v1859_v18, %v1859_v18 }
  0x4a   :  { %1206 = vmatpush3.bf16.msra.mxu0 %v1205_v15  ;;  %v1833_v15 = vld [vmem:[%s2171_s2 + $0x8] sm:$0xff] }
  0x4b   :  { %1208 = vmatprep.subr.bf16.mxu0 %v1207_v16  ;;  %v1835_v16 = vsub.s32 1, %v421_v54 }
  0x4e   :  { %1210 = vmatpush3.bf16.msra.mxu0 %v1209_v22  ;;  %v1845_v22 = vcombine.high %v1818_v11, %v1818_v11 }
  0x4f   :  { %1212 = vmatprep.subr.bf16.mxu0 %v1211_v23  ;;  %v1849_v23 = vcombine.high %v1823_v12, %v1823_v12 }
  0x52   :  { %1214 = vmatpush3.bf16.msra.mxu0 %v1213_v27  ;;  %v1867_v27 = vsub.s32 3, %v421_v54 }
  0x53   :  { %1216 = vmatprep.subr.bf16.mxu0 %v1215_v28  ;;  %v1871_v28 = vcombine.high %v1833_v15, %v1833_v15 }
  0x56   :  { %1218 = vmatpush3.bf16.msra.mxu0 %v1217_v33  ;;  %v1876_v33 = vld [vmem:[%s2171_s2 + $0x44] sm:$0xff] }
  0x57   :  { %1220 = vmatprep.subr.bf16.mxu0 %v1219_v34 }
  0x5a   :  { %1222 = vmatpush3.bf16.msra.mxu0 %v1221_v39 }
  0x5b   :  { %1224 = vmatprep.subr.bf16.mxu0 %v1223_v40 }
  0x5e   :  { %1226 = vmatpush3.bf16.msra.mxu0 %v1225_v45  ;;  %v1894_v45 = vcombine.high %v1876_v33, %v1876_v33 }
  0x5f   :  { %1228 = vmatprep.subr.bf16.mxu0 %v1227_v46 }
  0x62   :  { %1230 = vmatpush3.bf16.msra.mxu0 %v1229_v49 }
  0x65   :  { %393 = vmatmul.mubr.f32.vlgmr.msra.gmra.mrb[2].mxu0 %v1255_v8 }
 0x118   :  { %v252_v55 = vpop.f32.mrb[0].mxu0  ;;  %v323_v57 = vpop.f32.mrb[0].mxu1 }
 0x119   :  { %v254_v58 = vpop.f32.mrb[1].mxu0  ;;  %v325_v61 = vpop.f32.mrb[1].mxu1 }
 0x11a   :  { %v415_v59 = vcombine.low %v252_v55, %v254_v58  ;;  %v678_v60 = vcombine.high %v252_v55, %v254_v58  ;;  %v416_v62 = vcombine.low %v323_v57, %v325_v61  ;;  %v679_v63 = vcombine.high %v323_v57, %v325_v61 }
 0x11c   :  { %v423_v0 = vrot.slane %v415_v59, %v422_v56  ;;  %v687_v1 = vrot.slane %v678_v60, %v422_v56  ;;  %v430_v2 = vrot.slane %v416_v62, %v422_v56  ;;  %v694_v3 = vrot.slane %v679_v63, %v422_v56 }
 0x11e   :  { %v438_v4 = vcombine.low %v423_v0, %v430_v2  ;;  %v439_v5 = vcombine.high %v423_v0, %v430_v2  ;;  %v702_v6 = vcombine.low %v687_v1, %v694_v3  ;;  %v703_v7 = vcombine.high %v687_v1, %v694_v3 }
 0x120   :  { %v447_v29 = vrot.slane %v438_v4, %v422_v56  ;;  %v454_v34 = vrot.slane %v439_v5, %v422_v56  ;;  %v711_v42 = vrot.slane %v702_v6, %v422_v56  ;;  %v718_v43 = vrot.slane %v703_v7, %v422_v56 }
 0x138   :  { %v1068_v8 = vpop.f32.mrb[2].mxu0 }
 0x139   :  { %v1069_v10 = vpop.f32.mrb[3].mxu0 }
 0x13a   :  { %v1070_v13 = vadd.f32 %v1069_v10, %v1068_v8 }
 0x13c   :  { %v437_v20 = vrot.slane %v1070_v13, %v422_v56  ;;  %v680_v21 = vcombine.high %v1070_v13, %v1070_v13 }
 0x13e   :  { %v440_v30 = vcombine.high %v437_v20, %v437_v20  ;;  %v461_v31 = vrot.slane %v437_v20, %v422_v56  ;;  %v701_v32 = vrot.slane %v680_v21, %v422_v56 }
 0x140   :  { %v468_v38 = vrot.slane %v440_v30, %v422_v56  ;;  %v1888_v39 = vcombine.low %v447_v29, %v461_v31  ;;  %v1890_v40 = vcombine.high %v447_v29, %v461_v31  ;;  %v704_v41 = vcombine.high %v701_v32, %v701_v32 }
 0x141   :  { %v725_v44 = vrot.slane %v701_v32, %v422_v56 }
 0x142   :  { %v1896_v46 = vcombine.low %v454_v34, %v468_v38  ;;  %v1898_v47 = vcombine.high %v454_v34, %v468_v38  ;;  %v732_v48 = vrot.slane %v704_v41, %v422_v56  ;;  %v480_v49 = vrot.slane %v1888_v39, %v1835_v16 }
 0x143   :  { %v1902_v50 = vcombine.low %v711_v42, %v725_v44  ;;  %v1904_v51 = vcombine.high %v711_v42, %v725_v44  ;;  %v520_v52 = vrot.slane %v1890_v40, %v1835_v16  ;;  %v476_v53 = vrot.slane %v1888_v39, %v1841_v19 }
 0x144   :  { %v1910_v54 = vcombine.low %v718_v43, %v732_v48  ;;  %v1912_v55 = vcombine.high %v718_v43, %v732_v48  ;;  %v500_v56 = vrot.slane %v1896_v46, %v1835_v16  ;;  %v540_v57 = vrot.slane %v1898_v47, %v1835_v16 }
 0x145   :  { %v744_v58 = vrot.slane %v1902_v50, %v1835_v16  ;;  %v784_v59 = vrot.slane %v1904_v51, %v1835_v16  ;;  %v740_v60 = vrot.slane %v1902_v50, %v1841_v19  ;;  %v780_v61 = vrot.slane %v1904_v51, %v1841_v19 }
 0x146   :  { %v764_v62 = vrot.slane %v1910_v54, %v1835_v16  ;;  %v804_v63 = vrot.slane %v1912_v55, %v1835_v16  ;;  %v760_v0 = vrot.slane %v1910_v54, %v1841_v19  ;;  %v800_v1 = vrot.slane %v1912_v55, %v1841_v19 }
 0x147   :  { %v838_v2 = vmul.f32 %v744_v58, %v1839_v17  ;;  %v848_v3 = vmul.f32 %v784_v59, %v1849_v23  ;;  %v837_v4 = vmul.f32 %v740_v60, %v1813_v9  ;;  %v847_v5 = vmul.f32 %v780_v61, %v1823_v12 }
 0x148   :  { %v843_v6 = vmul.f32 %v764_v62, %v1845_v22  ;;  %v853_v7 = vmul.f32 %v804_v63, %v1863_v25  ;;  %v842_v8 = vmul.f32 %v760_v0, %v1818_v11  ;;  %v852_v10 = vmul.f32 %v800_v1, %v1828_v14 }
 0x149   :  { %v864_v13 = vsel %vm617_vm0, %v838_v2, 0.0  ;;  %v867_v16 = vsel %vm617_vm0, %v848_v3, 0.0  ;;  %v857_v20 = vsel %vm617_vm0, %v837_v4, 0.0  ;;  %v860_v21 = vsel %vm617_vm0, %v847_v5, 0.0 }
 0x14a   :  { %v865_v29 = vsel %vm617_vm0, %v843_v6, 0.0  ;;  %v869_v30 = vsel %vm617_vm0, %v853_v7, 0.0  ;;  %v858_v31 = vsel %vm617_vm0, %v842_v8, 0.0  ;;  %v862_v32 = vsel %vm617_vm0, %v852_v10, 0.0 }
 0x14b   :  { %v866_v34 = vadd.f32 %v865_v29, %v864_v13  ;;  %v859_v38 = vadd.f32 %v858_v31, %v857_v20  ;;  %v598_v41 = vmul.f32 %v1839_v17, %v480_v49  ;;  %v603_v42 = vmul.f32 %v1845_v22, %v500_v56 }
 0x14c   :  { %v608_v43 = vmul.f32 %v1849_v23, %v520_v52  ;;  %v613_v44 = vmul.f32 %v1863_v25, %v540_v57  ;;  %v496_v48 = vrot.slane %v1896_v46, %v1841_v19  ;;  %v516_v58 = vrot.slane %v1890_v40, %v1841_v19 }
 0x14d   :  { %v868_v59 = vadd.f32 %v867_v16, %v866_v34  ;;  %v861_v60 = vadd.f32 %v860_v21, %v859_v38  ;;  %v625_v61 = vsel %vm617_vm0, %v598_v41, 0.0  ;;  %v626_v62 = vsel %vm617_vm0, %v603_v42, 0.0 }
 0x14e   :  { %v627_v63 = vadd.f32 %v626_v62, %v625_v61  ;;  %v628_v17 = vsel %vm617_vm0, %v608_v43, 0.0  ;;  %v630_v22 = vsel %vm617_vm0, %v613_v44, 0.0  ;;  %v536_v23 = vrot.slane %v1898_v47, %v1841_v19 }
 0x14f   :  { %v1964_v25 = vadd.f32 %v869_v30, %v868_v59  ;;  %v1966_v49 = vadd.f32 %v862_v32, %v861_v60  ;;  %v597_v52 = vmul.f32 %v476_v53, %v1813_v9  ;;  %v602_v56 = vmul.f32 %v496_v48, %v1818_v11 }
 0x150   :  { %v629_v57 = vadd.f32 %v628_v17, %v627_v63  ;;  %v607_v0 = vmul.f32 %v516_v58, %v1823_v12  ;;  %v612_v1 = vmul.f32 %v536_v23, %v1828_v14  ;;  %v484_v2 = vrot.slane %v1888_v39, %v1865_v26 }
 0x151   :  { %899 = vrot.lane.b32.xlu1 %v1964_v25, %s1289_s13  ;;  %893 = vrot.lane.b32.xlu0 %v1966_v49, %s1289_s13  ;;  %v618_v19 = vsel %vm617_vm0, %v597_v52, 0.0  ;;  %v619_v9 = vsel %vm617_vm0, %v602_v56, 0.0  ;;  %v504_v11 = vrot.slane %v1896_v46, %v1865_v26  ;;  %v524_v12 = vrot.slane %v1890_v40, %v1865_v26 }
 0x152   :  { %v1984_v14 = vadd.f32 %v630_v22, %v629_v57  ;;  %v620_v53 = vadd.f32 %v619_v9, %v618_v19  ;;  %v621_v3 = vsel %vm617_vm0, %v607_v0, 0.0  ;;  %v623_v4 = vsel %vm617_vm0, %v612_v1, 0.0  ;;  %v921_v57 = vld [vmem:[%s2172_s3 + $0x8] sm:$0xff]  ;;  %v923_v9 = vld [vmem:[%s2172_s3 + $0x18] sm:$0xff] }
 0x153   :  { %v544_v5 = vrot.slane %v1898_v47, %v1865_v26  ;;  %v599_v6 = vmul.f32 %v484_v2, %v1833_v15  ;;  %v604_v7 = vmul.f32 %v504_v11, %v1854_v24  ;;  %v609_v8 = vmul.f32 %v524_v12, %v1859_v18  ;;  %v920_v11 = vld [vmem:[%s2172_s3] sm:$0xff]  ;;  %v922_v12 = vld [vmem:[%s2172_s3 + $0x10] sm:$0xff] }
 0x154   :  { %v622_v10 = vadd.f32 %v621_v3, %v620_v53  ;;  %v748_v13 = vrot.slane %v1902_v50, %v1865_v26  ;;  %v768_v16 = vrot.slane %v1910_v54, %v1865_v26  ;;  %v788_v20 = vrot.slane %v1904_v51, %v1865_v26 }
 0x155   :  { %661 = vrot.lane.b32.xlu1 %v1984_v14, %s1289_s13  ;;  %v614_v21 = vmul.f32 %v544_v5, %v1876_v33  ;;  %v632_v29 = vsel %vm617_vm0, %v599_v6, 0.0  ;;  %v633_v30 = vsel %vm617_vm0, %v604_v7, 0.0  ;;  %v635_v31 = vsel %vm617_vm0, %v609_v8, 0.0  ;;  %v925_v6 = vld [vmem:[%s2172_s3 + $0x28] sm:$0xff]  ;;  %v927_v7 = vld [vmem:[%s2172_s3 + $0x38] sm:$0xff] }
 0x156   :  { %v2005_v32 = vadd.f32 %v623_v4, %v622_v10  ;;  %v634_v34 = vadd.f32 %v633_v30, %v632_v29  ;;  %v808_v38 = vrot.slane %v1912_v55, %v1865_v26  ;;  %v839_v41 = vmul.f32 %v748_v13, %v1833_v15 }
 0x157   :  { %v637_v42 = vsel %vm617_vm0, %v614_v21, 0.0  ;;  %v844_v43 = vmul.f32 %v768_v16, %v1854_v24  ;;  %v849_v44 = vmul.f32 %v788_v20, %v1859_v18  ;;  %v488_v48 = vrot.slane %v1888_v39, %v1867_v27  ;;  %v924_v20 = vld [vmem:[%s2172_s3 + $0x20] sm:$0xff] }
 0x158   :  { %655 = vrot.lane.b32.xlu0 %v2005_v32, %s1289_s13  ;;  %v636_v58 = vadd.f32 %v635_v31, %v634_v34  ;;  %v854_v59 = vmul.f32 %v808_v38, %v1876_v33  ;;  %v871_v60 = vsel %vm617_vm0, %v839_v41, 0.0  ;;  %v508_v15 = vrot.slane %v1896_v46, %v1867_v27  ;;  %v400_v41 = vld [vmem:[%s2171_s2 + $0x10] sm:$0xf] }
 0x159   :  { %v872_v26 = vsel %vm617_vm0, %v844_v43, 0.0  ;;  %v874_v24 = vsel %vm617_vm0, %v849_v44, 0.0  ;;  %v528_v18 = vrot.slane %v1890_v40, %v1867_v27  ;;  %v548_v61 = vrot.slane %v1898_v47, %v1867_v27  ;;  %v403_v44 = vld [vmem:[%s2171_s2 + $0x24] sm:$0xf] }
 0x15a   :  { %v2027_v62 = vadd.f32 %v637_v42, %v636_v58  ;;  %v873_v63 = vadd.f32 %v872_v26, %v871_v60  ;;  %v876_v33 = vsel %vm617_vm0, %v854_v59, 0.0  ;;  %v600_v17 = vmul.f32 %v1871_v28, %v488_v48  ;;  %v406_v48 = vld [vmem:[%s2171_s2 + $0x38] sm:$0xf] }
 0x15b   :  { %v605_v22 = vmul.f32 %v1880_v35, %v508_v15  ;;  %v610_v23 = vmul.f32 %v1884_v36, %v528_v18  ;;  %v615_v52 = vmul.f32 %v1894_v45, %v548_v61  ;;  %v752_v56 = vrot.slane %v1902_v50, %v1867_v27 }
 0x15c   :  { %667 = vrot.lane.b32.xlu1 %v2027_v62, %s1289_s13  ;;  %v875_v0 = vadd.f32 %v874_v24, %v873_v63  ;;  %v639_v1 = vsel %vm617_vm0, %v600_v17, 0.0  ;;  %v772_v2 = vrot.slane %v1910_v54, %v1867_v27  ;;  %v792_v19 = vrot.slane %v1904_v51, %v1867_v27  ;;  %v409_v24 = vld [vmem:[%s2171_s2 + $0x4c] sm:$0xf] }
 0x15d   :  { %v640_v53 = vsel %vm617_vm0, %v605_v22, 0.0  ;;  %v642_v3 = vsel %vm617_vm0, %v610_v23, 0.0  ;;  %v644_v4 = vsel %vm617_vm0, %v615_v52, 0.0  ;;  %v812_v5 = vrot.slane %v1912_v55, %v1867_v27  ;;  %v926_v27 = vld [vmem:[%s2172_s3 + $0x30] sm:$0xff]  ;;  %v929_v17 = vld [vmem:[%s2172_s3 + $0x48] sm:$0xff]  ;;  %v928_v23 = vld [vmem:[%s2172_s3 + $0x40] sm:$0xff] }
 0x15e   :  { %v2066_v8 = vadd.f32 %v876_v33, %v875_v0  ;;  %v641_v10 = vadd.f32 %v640_v53, %v639_v1  ;;  %v840_v13 = vmul.f32 %v752_v56, %v1871_v28  ;;  %v845_v16 = vmul.f32 %v772_v2, %v1880_v35 }
 0x15f   :  { %v850_v21 = vmul.f32 %v792_v19, %v1884_v36  ;;  %v855_v29 = vmul.f32 %v812_v5, %v1894_v45  ;;  %v1231_v30 = vpack.c.bf16 %v923_v9, %v921_v57  ;;  %v1233_v31 = vpack.c.bf16 %v922_v12, %v920_v11  ;;  %v933_v19 = vld [vmem:[%s2172_s3 + $0x68] sm:$0xff]  ;;  %v935_v9 = vld [vmem:[%s2172_s3 + $0x78] sm:$0xff]  ;;  %v934_v5 = vld [vmem:[%s2172_s3 + $0x70] sm:$0xff] }
 0x160   :  { %905 = vrot.lane.b32.xlu0 %v2066_v8, %s1289_s13  ;;  %v643_v28 = vadd.f32 %v642_v3, %v641_v10  ;;  %v878_v35 = vsel %vm617_vm0, %v840_v13, 0.0  ;;  %v879_v34 = vsel %vm617_vm0, %v845_v16, 0.0  ;;  %v1235_v38 = vpack.c.bf16 %v927_v7, %v925_v6 }
 0x161   :  { %v880_v42 = vadd.f32 %v879_v34, %v878_v35  ;;  %v881_v36 = vsel %vm617_vm0, %v850_v21, 0.0  ;;  %v883_v45 = vsel %vm617_vm0, %v855_v29, 0.0  ;;  %1232 = vmatprep.subr.bf16.mxu1 %v1231_v30  ;;  %v1237_v43 = vpack.c.bf16 %v926_v27, %v924_v20 }
 0x162   :  { %v2093_v58 = vadd.f32 %v644_v4, %v643_v28  ;;  %1234 = vmatpush1.bf16.msra.mxu1 %v1233_v31  ;;  %v492_v59 = vrot.slane %v1888_v39, %v1886_v37  ;;  %v512_v60 = vrot.slane %v1896_v46, %v1886_v37  ;;  %v532_v15 = vrot.slane %v1890_v40, %v1886_v37  ;;  %v932_v4 = vld [vmem:[%s2172_s3 + $0x60] sm:$0xff] }
 0x163   :  { %v882_v26 = vadd.f32 %v881_v36, %v880_v42  ;;  %1236 = vmatprep.subr.bf16.mxu1 %v1235_v38  ;;  %v552_v18 = vrot.slane %v1898_v47, %v1886_v37  ;;  %v756_v61 = vrot.slane %v1902_v50, %v1886_v37  ;;  %v776_v39 = vrot.slane %v1910_v54, %v1886_v37  ;;  %v931_v54 = vld [vmem:[%s2172_s3 + $0x58] sm:$0xff] }
 0x164   :  { %673 = vrot.lane.b32.xlu1 %v2093_v58, %s1289_s13  ;;  %v601_v46 = vmul.f32 %v492_v59, %v400_v41  ;;  %v606_v40 = vmul.f32 %v512_v60, %v403_v44  ;;  %v611_v63 = vmul.f32 %v532_v15, %v406_v48  ;;  %v796_v33 = vrot.slane %v1904_v51, %v1886_v37  ;;  %v930_v51 = vld [vmem:[%s2172_s3 + $0x50] sm:$0xff]  ;;  %s1291_s3 = smov [#allocation2]  }
 0x165   :  { %v884_v47 = vadd.f32 %v883_v45, %v882_v26  ;;  %v816_v50 = vrot.slane %v1912_v55, %v1886_v37  ;;  %v841_v22 = vmul.f32 %v756_v61, %v400_v41  ;;  %v616_v52 = vmul.f32 %v552_v18, %v409_v24  ;;  %s1024_s1 = sshll.u32 %s1291_s3, 4  ;;  %s1025_s1 = int_to_ptr.vmem [resolvable:$true] %s1024_s1 }
 0x166   :  { %1238 = vmatpush1.bf16.msra.mxu1 %v1237_v43  ;;  %v647_v56 = vsel %vm646_vm1, %v601_v46, 0.0  ;;  %v648_v57 = vsel %vm646_vm1, %v606_v40, 0.0  ;;  %v846_v37 = vmul.f32 %v776_v39, %v403_v44  ;;  %v650_v0 = vsel %vm646_vm1, %v611_v63, 0.0  ;;  %s1264_s25 = scalar_lea.vmem %s1025_s1, 256  ;;  %p1269_p1 = scmp.lt.s32.totalorder %s1025_s1, %s1025_s1 }
 0x167   :  { %911 = vrot.lane.b32.xlu0 %v884_v47, %s1289_s13  ;;  %v649_v55 = vadd.f32 %v648_v57, %v647_v56  ;;  %v851_v1 = vmul.f32 %v796_v33, %v406_v48  ;;  %v856_v2 = vmul.f32 %v816_v50, %v409_v24  ;;  %v885_v11 = vsel %vm646_vm1, %v841_v22, 0.0  ;;  %p1265_p0 = scmp.ne.s32.totalorder %s1025_s1, %s1264_s25  ;;  %p1270_p2 = scmp.lt.s32.totalorder %s1264_s25, %s1264_s25 }
 0x168   :  { %v886_v12 = vsel %vm646_vm1, %v846_v37, 0.0  ;;  %v1239_v53 = vpack.c.bf16 %v931_v54, %v929_v17  ;;  %v1241_v3 = vpack.c.bf16 %v930_v51, %v928_v23  ;;  %v652_v10 = vsel %vm646_vm1, %v616_v52, 0.0 }
 0x169   :  { %v651_v6 = vadd.f32 %v650_v0, %v649_v55  ;;  %v887_v7 = vadd.f32 %v886_v12, %v885_v11  ;;  %v888_v13 = vsel %vm646_vm1, %v851_v1, 0.0  ;;  %v1243_v16 = vpack.c.bf16 %v935_v9, %v933_v19  ;;  %p1271_p3 = por %p1270_p2, %p1269_p1 }
 0x16a   :  { %1240 = vmatprep.subr.bf16.mxu1 %v1239_v53  ;;  %v1245_v21 = vpack.c.bf16 %v934_v5, %v932_v4  ;;  %v1290_v29 = vmov 0.0   ;;  %v890_v30 = vsel %vm646_vm1, %v856_v2, 0.0 }
 0x16b   :  { %v653_v20 = vadd.f32 %v652_v10, %v651_v6  ;;  %v889_v27 = vadd.f32 %v888_v13, %v887_v7  ;;  %1242 = vmatpush1.bf16.msra.mxu1 %v1241_v3  ;;  %1004 = vmatprep.mubr.f32.mxu1 %v1290_v29  ;;  %p1272_p4 = pnand %p1271_p3, %p1265_p0 }
 0x16c   :  { %1244 = vmatprep.subr.bf16.mxu1 %v1243_v16 }
 0x16d   :  { %v891_v31 = vadd.f32 %v890_v30, %v889_v27 }
 0x16f   :  { %1246 = vmatpush1.bf16.msra.mxu1 %v1245_v21 }
 0x1c3   :  { %v894_v28 = vpop.permute.xlu0 %893  ;;  %v900_v34 = vpop.permute.xlu1 %899 }
 0x1c4   :  { %v896_v35 = vadd.f32 %v894_v28, %v1966_v49 }
 0x1c6   :  { %v897_v38 = vadd.f32 %v896_v35, %v1964_v25 }
 0x1c7   :  { %v662_v42 = vpop.permute.xlu1 %661 }
 0x1c8   :  { %v902_v45 = vadd.f32 %v900_v34, %v897_v38 }
 0x1ca   :  { %v656_v41 = vpop.permute.xlu0 %655  ;;  %v903_v48 = vadd.f32 %v902_v45, %v2066_v8 }
 0x1cb   :  { %v658_v36 = vadd.f32 %v656_v41, %v2005_v32 }
 0x1cd   :  { %v659_v43 = vadd.f32 %v658_v36, %v1984_v14 }
 0x1ce   :  { %v668_v59 = vpop.permute.xlu1 %667 }
 0x1cf   :  { %v664_v44 = vadd.f32 %v662_v42, %v659_v43 }
 0x1d1   :  { %v665_v60 = vadd.f32 %v664_v44, %v2027_v62 }
 0x1d2   :  { %v906_v15 = vpop.permute.xlu0 %905 }
 0x1d3   :  { %v670_v26 = vadd.f32 %v668_v59, %v665_v60  ;;  %v908_v24 = vadd.f32 %v906_v15, %v903_v48 }
 0x1d5   :  { %v671_v49 = vadd.f32 %v670_v26, %v2093_v58  ;;  %v909_v18 = vadd.f32 %v908_v24, %v884_v47 }
 0x1d6   :  { %v674_v25 = vpop.permute.xlu1 %673 }
 0x1d7   :  { %v676_v61 = vadd.f32 %v674_v25, %v671_v49 }
 0x1d9   :  { %v912_v39 = vpop.permute.xlu0 %911  ;;  %v677_v32 = vadd.f32 %v676_v61, %v653_v20 }
 0x1da   :  { %v914_v46 = vadd.f32 %v912_v39, %v909_v18 }
 0x1dc   :  { %v915_v40 = vadd.f32 %v914_v46, %v891_v31 }
 0x1de   :  { %v917_v63 = vrot.slane %v915_v40, 4 }
 0x1e0   :  { %v919_v14 = vsel %vm617_vm0, %v677_v32, %v917_v63 }
 0x1e1   :  { %1035 = vmatmul.mubr.msk.f32.vlgmr.msra.gmra.mrb[2].mxu1 %vm936_vm2, %v919_v14 }
 0x2b4   :  { %v1006_v62 = vpop.f32.mrb[2].mxu1 }
 0x2b5   :  { %v1008_v8 = vpop.f32.mrb[3].mxu1 }
 0x2b6   :  { %v1013_v33 = vcombine.low %v1006_v62, %v1008_v8  ;;  %v1014_v17 = vcombine.high %v1006_v62, %v1008_v8 }
 0x2b8   :  { %1017 = vst [vmem:[#allocation2] sm:$0xff] %v1013_v33  ;;  %1018 = vst [vmem:[#allocation2 + $0x8] sm:$0xff] %v1014_v17 }
 0x2b9   :  { %1275 = shalt.err (!%p1272_p4)
}
 0x2ba   :  { %s1276_s28 = scalar_lea.hbm %s2173_s4, 256 }
 0x2bb   :  { %p1277_p5 = scmp.ne.s32.totalorder %s2173_s4, %s1276_s28  ;;  %p1280_p6 = scmp.lt.u32.totalorder %s1276_s28, %s2173_s4 }
 0x2bd   :  { %p1282_p7 = pnand %p1280_p6, %p1277_p5 }
 0x2bf   :  { %1285 = shalt.err (!%p1282_p7)
}
 0x2c0   :  { %s1292_s7 = smov 128   ;;  %s1293_s8 = smov 8  }
 0x2c1   :  { %1030 = dma.vmem_to_hbm [thread:$0]  %s1025_s1, 256, %s2173_s4, [#allocation3], %s1292_s7, %s1292_s7, %s1293_s8  }
 0x2c2   :  { %1286 = dma.done.wait [#allocation3], 256  }
 0x2c3   :  { %1287 = vsyncadd [#allocation3], 4294967040 }
 0x2c4   :  { %1034 = vsyncpa [#allocation3], 1 }

</bundles_post_ra>
